<compile_context>
chip_gen: v7x
topology: tpu7x:2x2x1
jax: 0.10.0
libtpu: 0.0.40
codegen_flags: <defaults>
</compile_context>

<pallas_src>
import functools

import jax
import jax.numpy as jnp
from jax.experimental import pallas as pl
from jax.experimental.pallas import tpu as pltpu

EPS = 1e-5                      # nn.BatchNorm default eps
MXU_DTYPE = jnp.bfloat16        # matmul input dtype (f32 accumulation)


def _round_up(a, b):
    return (a + b - 1) // b * b


# ----------------------------- Pallas kernels ------------------------------

def _conv_stats_kernel(cols_ref, w_ref, conv_ref, stats_ref):
    """One M-tile of Conv3d as a single MXU matmul + per-tile BN partials.

    cols_ref : [K, TILE_M]   bf16  im2col with the 27 taps folded into K
    w_ref    : [Cout, K]     bf16
    conv_ref : [Cout, TILE_M] f32  conv output (no bias; bias folds into BN)
    stats_ref: [1, Cout, 2]  f32   per-tile (sum, sum_of_squares)
    """
    acc = jnp.dot(w_ref[...], cols_ref[...],
                  preferred_element_type=jnp.float32)          # [Cout, TILE_M]
    conv_ref[...] = acc
    s = jnp.sum(acc, axis=1, keepdims=True)                    # [Cout, 1]
    ss = jnp.sum(acc * acc, axis=1, keepdims=True)             # [Cout, 1]
    stats_ref[...] = jnp.concatenate([s, ss], axis=1)[None]    # [1, Cout, 2]


def _bn_relu_kernel(conv_ref, scale_ref, shift_ref, y_ref):
    """y = relu(conv * scale + shift) on one lane-dense [Cout, TILE_M] tile."""
    y = conv_ref[...] * scale_ref[...] + shift_ref[...]
    y_ref[...] = jnp.maximum(y, 0.0).astype(y_ref.dtype)


def _maxpool_kernel(y_ref, o_ref, *, ker, stride):
    """MaxPool3d(ker, stride).  One (n, d_out) output slab per grid step.

    y_ref : [H, W, C]    input depth-slab at d = stride*do + kd
    o_ref : [Ho, Wo, C]  output slab for (n, do); revisited across the
                         'arbitrary' kd grid axis and max-accumulated.
    The H/W window taps are strided reads from the VMEM-resident slab.
    """
    kd = pl.program_id(2)
    Ho, Wo, _ = o_ref.shape
    m = None
    for kh in range(ker):
        for kw in range(ker):
            win = y_ref[pl.ds(kh, Ho, stride), pl.ds(kw, Wo, stride), :]
            m = win if m is None else jnp.maximum(m, win)

    @pl.when(kd == 0)
    def _init():
        o_ref[...] = m

    @pl.when(kd > 0)
    def _accumulate():
        o_ref[...] = jnp.maximum(o_ref[...], m)


# ------------------------------ JAX glue -----------------------------------

def _im2col_cm(x):
    """x: [C, N, D, H, W] -> [27*C, N*D*H*W] ('same' conv, pad=1).

    Row index = (kd*9 + kh*3 + kw) * C + c, matching the weight layout below.
    """
    C, N, D, H, W = x.shape
    xp = jnp.pad(x, ((0, 0), (0, 0), (1, 1), (1, 1), (1, 1)))
    cols = []
    for kd in range(3):
        for kh in range(3):
            for kw in range(3):
                cols.append(
                    xp[:, :, kd:kd + D, kh:kh + H, kw:kw + W].reshape(C, -1))
    return jnp.concatenate(cols, axis=0)


def luconv(x, w_torch, b, gamma, beta, *, tile_m=512):
    """Conv3d(k=3, pad=1) + ContBatchNorm3d (batch stats) + ReLU.

    x       : [Cin, N, D, H, W] f32
    w_torch : [Cout, Cin, 3, 3, 3]  (PyTorch layout)
    returns : [Cout, N, D, H, W] f32
    """
    Cin, N, D, H, W = x.shape
    Cout = w_torch.shape[0]
    K = 27 * Cin
    M = N * D * H * W

    # [Cout, Cin, kd, kh, kw] -> [Cout, (kd, kh, kw, Cin)] == [Cout, K]
    w2d = jnp.transpose(w_torch, (0, 2, 3, 4, 1)).reshape(Cout, K)
    w2d = w2d.astype(MXU_DTYPE)

    cols = _im2col_cm(x)                                    # [K, M] f32
    tile = min(tile_m, _round_up(M, 128))                   # lane-multiple tile
    Mp = _round_up(M, tile)
    if Mp != M:
        # Zero-padded columns give acc == 0 (no bias in-kernel), so they do
        # not perturb the BN sums; we divide by the true M below.
        cols = jnp.pad(cols, ((0, 0), (0, Mp - M)))
    cols = cols.astype(MXU_DTYPE)
    G = Mp // tile

    cparams = pltpu.CompilerParams(
        dimension_semantics=("parallel",),                  # shard M tiles (2 TCs on v7x)
        vmem_limit_bytes=32 * 1024 * 1024)

    # ---- pass 1: conv matmul + per-tile BN partial sums --------------------
    conv, stats = pl.pallas_call(
        _conv_stats_kernel,
        out_shape=(jax.ShapeDtypeStruct((Cout, Mp), jnp.float32),
                   jax.ShapeDtypeStruct((G, Cout, 2), jnp.float32)),
        grid=(G,),
        in_specs=[pl.BlockSpec((K, tile), lambda i: (0, i)),
                  pl.BlockSpec((Cout, K), lambda i: (0, 0))],
        out_specs=(pl.BlockSpec((Cout, tile), lambda i: (0, i)),
                   pl.BlockSpec((1, Cout, 2), lambda i: (i, 0, 0))),
        compiler_params=cparams,
        cost_estimate=pl.CostEstimate(
            flops=2 * Mp * K * Cout,
            transcendentals=0,
            bytes_accessed=(K * Mp + Cout * K) * 2 + Cout * Mp * 4
                           + G * Cout * 2 * 4),
    )(cols, w2d)

    # Global batch statistics (biased variance, as F.batch_norm training=True).
    # The conv bias `b` cancels exactly: mean(acc + b) = mean(acc) + b, var
    # unchanged, so (acc + b - mean - b) == (acc - mean).  It is folded away.
    # TODO(synk): running_mean/running_var momentum updates are a stateful
    # side effect that never affects this forward output; not reproduced.
    total = jnp.sum(stats[:, :, 0], axis=0)                 # [Cout]
    total_sq = jnp.sum(stats[:, :, 1], axis=0)              # [Cout]
    mean = total / M
    var = jnp.maximum(total_sq / M - mean * mean, 0.0)      # biased variance
    scale = gamma * jax.lax.rsqrt(var + EPS)
    shift = beta - mean * scale                             # bias-folded shift

    # ---- pass 2: normalize + affine + ReLU, lane-dense tiles ---------------
    y = pl.pallas_call(
        _bn_relu_kernel,
        out_shape=jax.ShapeDtypeStruct((Cout, Mp), jnp.float32),
        grid=(G,),
        in_specs=[pl.BlockSpec((Cout, tile), lambda i: (0, i)),
                  pl.BlockSpec((Cout, 1), lambda i: (0, 0)),
                  pl.BlockSpec((Cout, 1), lambda i: (0, 0))],
        out_specs=pl.BlockSpec((Cout, tile), lambda i: (0, i)),
        compiler_params=cparams,
    )(conv, scale.reshape(Cout, 1), shift.reshape(Cout, 1))

    return y[:, :M].reshape(Cout, N, D, H, W)


def maxpool3d(y, *, ker=3, stride=2):
    """MaxPool3d(ker, stride) on NDHWC input -> [N, Do, Ho, Wo, C]."""
    N, D, H, W, C = y.shape
    Do = (D - ker) // stride + 1
    Ho = (H - ker) // stride + 1
    Wo = (W - ker) // stride + 1
    kern = functools.partial(_maxpool_kernel, ker=ker, stride=stride)
    return pl.pallas_call(
        kern,
        out_shape=jax.ShapeDtypeStruct((N, Do, Ho, Wo, C), y.dtype),
        grid=(N, Do, ker),
        in_specs=[pl.BlockSpec(
            (None, None, H, W, C),
            lambda n, do, kd: (n, stride * do + kd, 0, 0, 0))],
        out_specs=pl.BlockSpec(
            (None, None, Ho, Wo, C),
            lambda n, do, kd: (n, do, 0, 0, 0)),
        compiler_params=pltpu.CompilerParams(
            dimension_semantics=("parallel", "parallel", "arbitrary")),
    )(y)


def down_transition(x_ncdhw, p, *, tile_m=512):
    """x: [N, Cin, D, H, W] (NCDHW, as in PyTorch) -> [N, Cout, Do, Ho, Wo]."""
    xc = jnp.transpose(x_ncdhw, (1, 0, 2, 3, 4))            # [Cin, N, D, H, W]
    y = luconv(xc, p["w1"], p["b1"], p["g1"], p["be1"], tile_m=tile_m)
    y = luconv(y, p["w2"], p["b2"], p["g2"], p["be2"], tile_m=tile_m)
    y = jnp.transpose(y, (1, 2, 3, 4, 0))                   # [N, D, H, W, Cout]
    y = maxpool3d(y, ker=3, stride=2)                       # [N, Do, Ho, Wo, C]
    return jnp.transpose(y, (0, 4, 1, 2, 3))                # back to NCDHW


# ------------------------- deterministic params -----------------------------

def init_params(key, in_channel, out_channel):
    ks = jax.random.split(key, 6)
    return {
        # PyTorch Conv3d weight layout [Cout, Cin, 3, 3, 3]
        "w1": 0.1 * jax.random.normal(ks[0], (out_channel, in_channel, 3, 3, 3),
                                      jnp.float32),
        "b1": 0.01 * jax.random.normal(ks[1], (out_channel,), jnp.float32),
        "g1": 1.0 + 0.1 * jax.random.normal(ks[2], (out_channel,), jnp.float32),
        "be1": 0.1 * jax.random.normal(ks[3], (out_channel,), jnp.float32),
        "w2": 0.1 * jax.random.normal(ks[4], (out_channel, out_channel, 3, 3, 3),
                                      jnp.float32),
        "b2": 0.01 * jax.random.normal(ks[5], (out_channel,), jnp.float32),
        "g2": jnp.ones((out_channel,), jnp.float32),        # PyTorch BN default
        "be2": jnp.zeros((out_channel,), jnp.float32),
    }


# --------------------------- pure-JAX reference -----------------------------

def _ref_luconv(x, w_torch, b, g, be):
    # Mirrors the kernel's bf16 MXU inputs (f32 accumulation).  The conv bias
    # is applied here and cancels under training-mode BN, as in PyTorch.
    wk = jnp.transpose(w_torch, (2, 3, 4, 1, 0)).astype(MXU_DTYPE)   # DHWIO
    y = jax.lax.conv_general_dilated(
        x.astype(MXU_DTYPE), wk, window_strides=(1, 1, 1), padding="SAME",
        dimension_numbers=("NDHWC", "DHWIO", "NDHWC"),
        preferred_element_type=jnp.float32)
    y = y + b
    mean = jnp.mean(y, axis=(0, 1, 2, 3))
    var = jnp.mean(jnp.square(y - mean), axis=(0, 1, 2, 3))  # biased, as BN
    y = (y - mean) * jax.lax.rsqrt(var + EPS) * g + be
    return jnp.maximum(y, 0.0)


def _ref_down_transition(x_ncdhw, p):
    x = jnp.transpose(x_ncdhw, (0, 2, 3, 4, 1))
    y = _ref_luconv(x, p["w1"], p["b1"], p["g1"], p["be1"])
    y = _ref_luconv(y, p["w2"], p["b2"], p["g2"], p["be2"])
    y = jax.lax.reduce_window(y, -jnp.inf, jax.lax.max,
                              (1, 3, 3, 3, 1), (1, 2, 2, 2, 1), "VALID")
    return jnp.transpose(y, (0, 4, 1, 2, 3))


# --------------------------------- main --------------------------------------

if __name__ == "__main__":
    key = jax.random.PRNGKey(0)
    kx, kp = jax.random.split(key)

    N, Cin, Cout, S = 2, 2, 4, 8                  # small but conv/pool-valid
    x = jax.random.normal(kx, (N, Cin, S, S, S), jnp.float32)   # NCDHW
    params = init_params(kp, Cin, Cout)

    out = jax.jit(down_transition)(x, params)
    out = jax.block_until_ready(out)

    # sanity: shape and numeric agreement with a pure-JAX reference
    assert out.shape == (N, Cout, 3, 3, 3), out.shape
    ref = _ref_down_transition(x, params)
    err = float(jnp.max(jnp.abs(out - ref)))
    assert err < 1e-2, f"max abs err {err}"

    print("KERNEL_OK")
</pallas_src>

<mosaic_0001>
module attributes {stable_mosaic.version = 11 : i64} {
  func.func @_conv_stats_kernel(%arg0: i32, %arg1: memref<54x512xbf16, #tpu.memory_space<vmem>>, %arg2: memref<4x54xbf16, #tpu.memory_space<vmem>>, %arg3: memref<4x512xf32, #tpu.memory_space<vmem>>, %arg4: memref<1x4x2xf32, #tpu.memory_space<vmem>>) attributes {dimension_semantics = [#tpu.dimension_semantics<parallel>], iteration_bounds = array<i64: 2>, scalar_prefetch = 0 : i64, scratch_operands = 0 : i64, tpu.core_type = #tpu.core_type<tc>, window_params = [{transform_indices = @transform_0, window_bounds = array<i64: 54, 512>}, {pipeline_mode = #tpu.pipeline_mode<synchronous>, transform_indices = @transform_1, window_bounds = array<i64: 4, 54>}, {transform_indices = @transform_2, window_bounds = array<i64: 4, 512>}, {transform_indices = @transform_3, window_bounds = array<i64: 1, 4, 2>}]} {
    %c0 = arith.constant 0 : index
    %c0_0 = arith.constant 0 : index
    %0 = vector.load %arg2[%c0, %c0_0] : memref<4x54xbf16, #tpu.memory_space<vmem>>, vector<4x54xbf16>
    %c0_1 = arith.constant 0 : index
    %c0_2 = arith.constant 0 : index
    %1 = vector.load %arg1[%c0_1, %c0_2] : memref<54x512xbf16, #tpu.memory_space<vmem>>, vector<54x512xbf16>
    %cst = arith.constant dense<0.000000e+00> : vector<4x512xf32>
    %2 = tpu.matmul %0, %1, %cst {dimension_numbers = #tpu.dot_dimension_numbers<[1], [0], [0], [1], [0, 0, 1, 1], [], []>} : vector<4x54xbf16>, vector<54x512xbf16>, vector<4x512xf32> -> vector<4x512xf32>
    %c0_3 = arith.constant 0 : index
    %c0_4 = arith.constant 0 : index
    %3 = vector.load %arg3[%c0_3, %c0_4] : memref<4x512xf32, #tpu.memory_space<vmem>>, vector<4x512xf32>
    tpu.vector_store %arg3[%c0_3, %c0_4], %2 {strides = array<i32>} : memref<4x512xf32, #tpu.memory_space<vmem>>, vector<4x512xf32>,
    %cst_5 = arith.constant dense<0.000000e+00> : vector<4xf32>
    %4 = vector.multi_reduction <add>, %2, %cst_5 [1] : vector<4x512xf32> to vector<4xf32>
    %5 = vector.shape_cast %4 : vector<4xf32> to vector<4x1xf32>
    %6 = arith.mulf %2, %2 : vector<4x512xf32>
    %cst_6 = arith.constant dense<0.000000e+00> : vector<4xf32>
    %7 = vector.multi_reduction <add>, %6, %cst_6 [1] : vector<4x512xf32> to vector<4xf32>
    %8 = vector.shape_cast %7 : vector<4xf32> to vector<4x1xf32>
    %9 = tpu.concatenate %5, %8 in 1 : vector<4x1xf32>, vector<4x1xf32> -> vector<4x2xf32>
    %10 = vector.shape_cast %9 : vector<4x2xf32> to vector<1x4x2xf32>
    %c0_7 = arith.constant 0 : index
    %c0_8 = arith.constant 0 : index
    %c0_9 = arith.constant 0 : index
    %11 = vector.load %arg4[%c0_7, %c0_8, %c0_9] : memref<1x4x2xf32, #tpu.memory_space<vmem>>, vector<1x4x2xf32>
    tpu.vector_store %arg4[%c0_7, %c0_8, %c0_9], %10 {strides = array<i32>} : memref<1x4x2xf32, #tpu.memory_space<vmem>>, vector<1x4x2xf32>,
    return
  }
  func.func @transform_0(%arg0: i32) -> (i32, i32) {
    %c0_i32 = arith.constant 0 : i32
    %c0_i32_0 = arith.constant 0 : i32
    return %c0_i32, %arg0 : i32, i32
  }
  func.func @transform_1(%arg0: i32) -> (i32, i32) {
    %c0_i32 = arith.constant 0 : i32
    %c0_i32_0 = arith.constant 0 : i32
    %c0_i32_1 = arith.constant 0 : i32
    return %c0_i32, %c0_i32_0 : i32, i32
  }
  func.func @transform_2(%arg0: i32) -> (i32, i32) {
    %c0_i32 = arith.constant 0 : i32
    %c0_i32_0 = arith.constant 0 : i32
    return %c0_i32, %arg0 : i32, i32
  }
  func.func @transform_3(%arg0: i32) -> (i32, i32, i32) {
    %c0_i32 = arith.constant 0 : i32
    %c0_i32_0 = arith.constant 0 : i32
    %c0_i32_1 = arith.constant 0 : i32
    return %arg0, %c0_i32, %c0_i32_0 : i32, i32, i32
  }
}

module attributes {stable_mosaic.version = 11 : i64} {
  func.func @_bn_relu_kernel(%arg0: i32, %arg1: memref<4x512xf32, #tpu.memory_space<vmem>>, %arg2: memref<4x1xf32, #tpu.memory_space<vmem>>, %arg3: memref<4x1xf32, #tpu.memory_space<vmem>>, %arg4: memref<4x512xf32, #tpu.memory_space<vmem>>) attributes {dimension_semantics = [#tpu.dimension_semantics<parallel>], iteration_bounds = array<i64: 2>, scalar_prefetch = 0 : i64, scratch_operands = 0 : i64, tpu.core_type = #tpu.core_type<tc>, window_params = [{transform_indices = @transform_0, window_bounds = array<i64: 4, 512>}, {pipeline_mode = #tpu.pipeline_mode<synchronous>, transform_indices = @transform_1, window_bounds = array<i64: 4, 1>}, {pipeline_mode = #tpu.pipeline_mode<synchronous>, transform_indices = @transform_2, window_bounds = array<i64: 4, 1>}, {transform_indices = @transform_3, window_bounds = array<i64: 4, 512>}]} {
    %c0 = arith.constant 0 : index
    %c0_0 = arith.constant 0 : index
    %0 = vector.load %arg1[%c0, %c0_0] : memref<4x512xf32, #tpu.memory_space<vmem>>, vector<4x512xf32>
    %c0_1 = arith.constant 0 : index
    %c0_2 = arith.constant 0 : index
    %1 = vector.load %arg2[%c0_1, %c0_2] : memref<4x1xf32, #tpu.memory_space<vmem>>, vector<4x1xf32>
    %2 = vector.broadcast %1 : vector<4x1xf32> to vector<4x512xf32>
    %3 = arith.mulf %0, %2 : vector<4x512xf32>
    %c0_3 = arith.constant 0 : index
    %c0_4 = arith.constant 0 : index
    %4 = vector.load %arg3[%c0_3, %c0_4] : memref<4x1xf32, #tpu.memory_space<vmem>>, vector<4x1xf32>
    %5 = vector.broadcast %4 : vector<4x1xf32> to vector<4x512xf32>
    %6 = arith.addf %3, %5 : vector<4x512xf32>
    %cst = arith.constant 0.000000e+00 : f32
    %7 = vector.broadcast %cst : f32 to vector<4x512xf32>
    %8 = arith.maximumf %6, %7 : vector<4x512xf32>
    %c0_5 = arith.constant 0 : index
    %c0_6 = arith.constant 0 : index
    %9 = vector.load %arg4[%c0_5, %c0_6] : memref<4x512xf32, #tpu.memory_space<vmem>>, vector<4x512xf32>
    tpu.vector_store %arg4[%c0_5, %c0_6], %8 {strides = array<i32>} : memref<4x512xf32, #tpu.memory_space<vmem>>, vector<4x512xf32>,
    return
  }
  func.func @transform_0(%arg0: i32) -> (i32, i32) {
    %c0_i32 = arith.constant 0 : i32
    %c0_i32_0 = arith.constant 0 : i32
    return %c0_i32, %arg0 : i32, i32
  }
  func.func @transform_1(%arg0: i32) -> (i32, i32) {
    %c0_i32 = arith.constant 0 : i32
    %c0_i32_0 = arith.constant 0 : i32
    %c0_i32_1 = arith.constant 0 : i32
    return %c0_i32, %c0_i32_0 : i32, i32
  }
  func.func @transform_2(%arg0: i32) -> (i32, i32) {
    %c0_i32 = arith.constant 0 : i32
    %c0_i32_0 = arith.constant 0 : i32
    %c0_i32_1 = arith.constant 0 : i32
    return %c0_i32, %c0_i32_0 : i32, i32
  }
  func.func @transform_3(%arg0: i32) -> (i32, i32) {
    %c0_i32 = arith.constant 0 : i32
    %c0_i32_0 = arith.constant 0 : i32
    return %c0_i32, %arg0 : i32, i32
  }
}

module attributes {stable_mosaic.version = 11 : i64} {
  func.func @_conv_stats_kernel(%arg0: i32, %arg1: memref<108x512xbf16, #tpu.memory_space<vmem>>, %arg2: memref<4x108xbf16, #tpu.memory_space<vmem>>, %arg3: memref<4x512xf32, #tpu.memory_space<vmem>>, %arg4: memref<1x4x2xf32, #tpu.memory_space<vmem>>) attributes {dimension_semantics = [#tpu.dimension_semantics<parallel>], iteration_bounds = array<i64: 2>, scalar_prefetch = 0 : i64, scratch_operands = 0 : i64, tpu.core_type = #tpu.core_type<tc>, window_params = [{transform_indices = @transform_0, window_bounds = array<i64: 108, 512>}, {pipeline_mode = #tpu.pipeline_mode<synchronous>, transform_indices = @transform_1, window_bounds = array<i64: 4, 108>}, {transform_indices = @transform_2, window_bounds = array<i64: 4, 512>}, {transform_indices = @transform_3, window_bounds = array<i64: 1, 4, 2>}]} {
    %c0 = arith.constant 0 : index
    %c0_0 = arith.constant 0 : index
    %0 = vector.load %arg2[%c0, %c0_0] : memref<4x108xbf16, #tpu.memory_space<vmem>>, vector<4x108xbf16>
    %c0_1 = arith.constant 0 : index
    %c0_2 = arith.constant 0 : index
    %1 = vector.load %arg1[%c0_1, %c0_2] : memref<108x512xbf16, #tpu.memory_space<vmem>>, vector<108x512xbf16>
    %cst = arith.constant dense<0.000000e+00> : vector<4x512xf32>
    %2 = tpu.matmul %0, %1, %cst {dimension_numbers = #tpu.dot_dimension_numbers<[1], [0], [0], [1], [0, 0, 1, 1], [], []>} : vector<4x108xbf16>, vector<108x512xbf16>, vector<4x512xf32> -> vector<4x512xf32>
    %c0_3 = arith.constant 0 : index
    %c0_4 = arith.constant 0 : index
    %3 = vector.load %arg3[%c0_3, %c0_4] : memref<4x512xf32, #tpu.memory_space<vmem>>, vector<4x512xf32>
    tpu.vector_store %arg3[%c0_3, %c0_4], %2 {strides = array<i32>} : memref<4x512xf32, #tpu.memory_space<vmem>>, vector<4x512xf32>,
    %cst_5 = arith.constant dense<0.000000e+00> : vector<4xf32>
    %4 = vector.multi_reduction <add>, %2, %cst_5 [1] : vector<4x512xf32> to vector<4xf32>
    %5 = vector.shape_cast %4 : vector<4xf32> to vector<4x1xf32>
    %6 = arith.mulf %2, %2 : vector<4x512xf32>
    %cst_6 = arith.constant dense<0.000000e+00> : vector<4xf32>
    %7 = vector.multi_reduction <add>, %6, %cst_6 [1] : vector<4x512xf32> to vector<4xf32>
    %8 = vector.shape_cast %7 : vector<4xf32> to vector<4x1xf32>
    %9 = tpu.concatenate %5, %8 in 1 : vector<4x1xf32>, vector<4x1xf32> -> vector<4x2xf32>
    %10 = vector.shape_cast %9 : vector<4x2xf32> to vector<1x4x2xf32>
    %c0_7 = arith.constant 0 : index
    %c0_8 = arith.constant 0 : index
    %c0_9 = arith.constant 0 : index
    %11 = vector.load %arg4[%c0_7, %c0_8, %c0_9] : memref<1x4x2xf32, #tpu.memory_space<vmem>>, vector<1x4x2xf32>
    tpu.vector_store %arg4[%c0_7, %c0_8, %c0_9], %10 {strides = array<i32>} : memref<1x4x2xf32, #tpu.memory_space<vmem>>, vector<1x4x2xf32>,
    return
  }
  func.func @transform_0(%arg0: i32) -> (i32, i32) {
    %c0_i32 = arith.constant 0 : i32
    %c0_i32_0 = arith.constant 0 : i32
    return %c0_i32, %arg0 : i32, i32
  }
  func.func @transform_1(%arg0: i32) -> (i32, i32) {
    %c0_i32 = arith.constant 0 : i32
    %c0_i32_0 = arith.constant 0 : i32
    %c0_i32_1 = arith.constant 0 : i32
    return %c0_i32, %c0_i32_0 : i32, i32
  }
  func.func @transform_2(%arg0: i32) -> (i32, i32) {
    %c0_i32 = arith.constant 0 : i32
    %c0_i32_0 = arith.constant 0 : i32
    return %c0_i32, %arg0 : i32, i32
  }
  func.func @transform_3(%arg0: i32) -> (i32, i32, i32) {
    %c0_i32 = arith.constant 0 : i32
    %c0_i32_0 = arith.constant 0 : i32
    %c0_i32_1 = arith.constant 0 : i32
    return %arg0, %c0_i32, %c0_i32_0 : i32, i32, i32
  }
}

module attributes {stable_mosaic.version = 11 : i64} {
  func.func @_maxpool_kernel(%arg0: i32, %arg1: i32, %arg2: i32, %arg3: memref<1x1x8x8x4xf32, #tpu.memory_space<vmem>>, %arg4: memref<1x1x3x3x4xf32, #tpu.memory_space<vmem>>) attributes {dimension_semantics = [#tpu.dimension_semantics<parallel>, #tpu.dimension_semantics<parallel>, #tpu.dimension_semantics<arbitrary>], iteration_bounds = array<i64: 2, 3, 3>, scalar_prefetch = 0 : i64, scratch_operands = 0 : i64, tpu.core_type = #tpu.core_type<tc>, window_params = [{transform_indices = @transform_0, window_bounds = array<i64: 1, 1, 8, 8, 4>}, {transform_indices = @transform_1, window_bounds = array<i64: 1, 1, 3, 3, 4>}]} {
    %c0 = arith.constant 0 : index
    %c0_0 = arith.constant 0 : index
    %c0_1 = arith.constant 0 : index
    %c0_2 = arith.constant 0 : index
    %c0_3 = arith.constant 0 : index
    %0 = tpu.strided_load %arg3[%c0, %c0_0, %c0_1, %c0_2, %c0_3] {strides = array<i32: 1, 1, 2, 2, 1>} : memref<1x1x8x8x4xf32, #tpu.memory_space<vmem>>, vector<1x1x3x3x4xf32>
    %1 = vector.shape_cast %0 : vector<1x1x3x3x4xf32> to vector<3x3x4xf32>
    %c0_4 = arith.constant 0 : index
    %c0_5 = arith.constant 0 : index
    %c0_6 = arith.constant 0 : index
    %c1 = arith.constant 1 : index
    %c0_7 = arith.constant 0 : index
    %2 = tpu.strided_load %arg3[%c0_4, %c0_5, %c0_6, %c1, %c0_7] {strides = array<i32: 1, 1, 2, 2, 1>} : memref<1x1x8x8x4xf32, #tpu.memory_space<vmem>>, vector<1x1x3x3x4xf32>
    %3 = vector.shape_cast %2 : vector<1x1x3x3x4xf32> to vector<3x3x4xf32>
    %4 = arith.maximumf %1, %3 : vector<3x3x4xf32>
    %c0_8 = arith.constant 0 : index
    %c0_9 = arith.constant 0 : index
    %c0_10 = arith.constant 0 : index
    %c2 = arith.constant 2 : index
    %c0_11 = arith.constant 0 : index
    %5 = tpu.strided_load %arg3[%c0_8, %c0_9, %c0_10, %c2, %c0_11] {strides = array<i32: 1, 1, 2, 2, 1>} : memref<1x1x8x8x4xf32, #tpu.memory_space<vmem>>, vector<1x1x3x3x4xf32>
    %6 = vector.shape_cast %5 : vector<1x1x3x3x4xf32> to vector<3x3x4xf32>
    %7 = arith.maximumf %4, %6 : vector<3x3x4xf32>
    %c0_12 = arith.constant 0 : index
    %c0_13 = arith.constant 0 : index
    %c1_14 = arith.constant 1 : index
    %c0_15 = arith.constant 0 : index
    %c0_16 = arith.constant 0 : index
    %8 = tpu.strided_load %arg3[%c0_12, %c0_13, %c1_14, %c0_15, %c0_16] {strides = array<i32: 1, 1, 2, 2, 1>} : memref<1x1x8x8x4xf32, #tpu.memory_space<vmem>>, vector<1x1x3x3x4xf32>
    %9 = vector.shape_cast %8 : vector<1x1x3x3x4xf32> to vector<3x3x4xf32>
    %10 = arith.maximumf %7, %9 : vector<3x3x4xf32>
    %c0_17 = arith.constant 0 : index
    %c0_18 = arith.constant 0 : index
    %c1_19 = arith.constant 1 : index
    %c1_20 = arith.constant 1 : index
    %c0_21 = arith.constant 0 : index
    %11 = tpu.strided_load %arg3[%c0_17, %c0_18, %c1_19, %c1_20, %c0_21] {strides = array<i32: 1, 1, 2, 2, 1>} : memref<1x1x8x8x4xf32, #tpu.memory_space<vmem>>, vector<1x1x3x3x4xf32>
    %12 = vector.shape_cast %11 : vector<1x1x3x3x4xf32> to vector<3x3x4xf32>
    %13 = arith.maximumf %10, %12 : vector<3x3x4xf32>
    %c0_22 = arith.constant 0 : index
    %c0_23 = arith.constant 0 : index
    %c1_24 = arith.constant 1 : index
    %c2_25 = arith.constant 2 : index
    %c0_26 = arith.constant 0 : index
    %14 = tpu.strided_load %arg3[%c0_22, %c0_23, %c1_24, %c2_25, %c0_26] {strides = array<i32: 1, 1, 2, 2, 1>} : memref<1x1x8x8x4xf32, #tpu.memory_space<vmem>>, vector<1x1x3x3x4xf32>
    %15 = vector.shape_cast %14 : vector<1x1x3x3x4xf32> to vector<3x3x4xf32>
    %16 = arith.maximumf %13, %15 : vector<3x3x4xf32>
    %c0_27 = arith.constant 0 : index
    %c0_28 = arith.constant 0 : index
    %c2_29 = arith.constant 2 : index
    %c0_30 = arith.constant 0 : index
    %c0_31 = arith.constant 0 : index
    %17 = tpu.strided_load %arg3[%c0_27, %c0_28, %c2_29, %c0_30, %c0_31] {strides = array<i32: 1, 1, 2, 2, 1>} : memref<1x1x8x8x4xf32, #tpu.memory_space<vmem>>, vector<1x1x3x3x4xf32>
    %18 = vector.shape_cast %17 : vector<1x1x3x3x4xf32> to vector<3x3x4xf32>
    %19 = arith.maximumf %16, %18 : vector<3x3x4xf32>
    %c0_32 = arith.constant 0 : index
    %c0_33 = arith.constant 0 : index
    %c2_34 = arith.constant 2 : index
    %c1_35 = arith.constant 1 : index
    %c0_36 = arith.constant 0 : index
    %20 = tpu.strided_load %arg3[%c0_32, %c0_33, %c2_34, %c1_35, %c0_36] {strides = array<i32: 1, 1, 2, 2, 1>} : memref<1x1x8x8x4xf32, #tpu.memory_space<vmem>>, vector<1x1x3x3x4xf32>
    %21 = vector.shape_cast %20 : vector<1x1x3x3x4xf32> to vector<3x3x4xf32>
    %22 = arith.maximumf %19, %21 : vector<3x3x4xf32>
    %c0_37 = arith.constant 0 : index
    %c0_38 = arith.constant 0 : index
    %c2_39 = arith.constant 2 : index
    %c2_40 = arith.constant 2 : index
    %c0_41 = arith.constant 0 : index
    %23 = tpu.strided_load %arg3[%c0_37, %c0_38, %c2_39, %c2_40, %c0_41] {strides = array<i32: 1, 1, 2, 2, 1>} : memref<1x1x8x8x4xf32, #tpu.memory_space<vmem>>, vector<1x1x3x3x4xf32>
    %24 = vector.shape_cast %23 : vector<1x1x3x3x4xf32> to vector<3x3x4xf32>
    %25 = arith.maximumf %22, %24 : vector<3x3x4xf32>
    %c0_i32 = arith.constant 0 : i32
    %26 = arith.cmpi eq, %arg2, %c0_i32 : i32
    %27 = arith.extui %26 : i1 to i32
    %c0_i32_42 = arith.constant 0 : i32
    %28 = arith.cmpi ne, %27, %c0_i32_42 : i32
    scf.if %28 {
      %c0_45 = arith.constant 0 : index
      %c0_46 = arith.constant 0 : index
      %c0_47 = arith.constant 0 : index
      %c0_48 = arith.constant 0 : index
      %c0_49 = arith.constant 0 : index
      %32 = vector.load %arg4[%c0_45, %c0_46, %c0_47, %c0_48, %c0_49] : memref<1x1x3x3x4xf32, #tpu.memory_space<vmem>>, vector<1x1x3x3x4xf32>
      %33 = vector.shape_cast %32 : vector<1x1x3x3x4xf32> to vector<3x3x4xf32>
      %34 = vector.shape_cast %25 : vector<3x3x4xf32> to vector<1x1x3x3x4xf32>
      tpu.vector_store %arg4[%c0_45, %c0_46, %c0_47, %c0_48, %c0_49], %34 {strides = array<i32>} : memref<1x1x3x3x4xf32, #tpu.memory_space<vmem>>, vector<1x1x3x3x4xf32>,
    } else {
    }
    %c0_i32_43 = arith.constant 0 : i32
    %29 = arith.cmpi sgt, %arg2, %c0_i32_43 : i32
    %30 = arith.extui %29 : i1 to i32
    %c0_i32_44 = arith.constant 0 : i32
    %31 = arith.cmpi ne, %30, %c0_i32_44 : i32
    scf.if %31 {
      %c0_45 = arith.constant 0 : index
      %c0_46 = arith.constant 0 : index
      %c0_47 = arith.constant 0 : index
      %c0_48 = arith.constant 0 : index
      %c0_49 = arith.constant 0 : index
      %32 = vector.load %arg4[%c0_45, %c0_46, %c0_47, %c0_48, %c0_49] : memref<1x1x3x3x4xf32, #tpu.memory_space<vmem>>, vector<1x1x3x3x4xf32>
      %33 = vector.shape_cast %32 : vector<1x1x3x3x4xf32> to vector<3x3x4xf32>
      %34 = arith.maximumf %33, %25 : vector<3x3x4xf32>
      %c0_50 = arith.constant 0 : index
      %c0_51 = arith.constant 0 : index
      %c0_52 = arith.constant 0 : index
      %c0_53 = arith.constant 0 : index
      %c0_54 = arith.constant 0 : index
      %35 = vector.load %arg4[%c0_50, %c0_51, %c0_52, %c0_53, %c0_54] : memref<1x1x3x3x4xf32, #tpu.memory_space<vmem>>, vector<1x1x3x3x4xf32>
      %36 = vector.shape_cast %35 : vector<1x1x3x3x4xf32> to vector<3x3x4xf32>
      %37 = vector.shape_cast %34 : vector<3x3x4xf32> to vector<1x1x3x3x4xf32>
      tpu.vector_store %arg4[%c0_50, %c0_51, %c0_52, %c0_53, %c0_54], %37 {strides = array<i32>} : memref<1x1x3x3x4xf32, #tpu.memory_space<vmem>>, vector<1x1x3x3x4xf32>,
    } else {
    }
    return
  }
  func.func @transform_0(%arg0: i32, %arg1: i32, %arg2: i32) -> (i32, i32, i32, i32, i32) {
    %c2_i32 = arith.constant 2 : i32
    %0 = arith.muli %c2_i32, %arg1 : i32
    %1 = arith.addi %0, %arg2 : i32
    %c0_i32 = arith.constant 0 : i32
    %c0_i32_0 = arith.constant 0 : i32
    %c0_i32_1 = arith.constant 0 : i32
    %c0_i32_2 = arith.constant 0 : i32
    return %arg0, %1, %c0_i32, %c0_i32_0, %c0_i32_1 : i32, i32, i32, i32, i32
  }
  func.func @transform_1(%arg0: i32, %arg1: i32, %arg2: i32) -> (i32, i32, i32, i32, i32) {
    %c0_i32 = arith.constant 0 : i32
    %c0_i32_0 = arith.constant 0 : i32
    %c0_i32_1 = arith.constant 0 : i32
    %c0_i32_2 = arith.constant 0 : i32
    return %arg0, %arg1, %c0_i32, %c0_i32_0, %c0_i32_1 : i32, i32, i32, i32, i32
  }
}

</mosaic_0001>

<bundles_post_ra>
// kernel: down_transition.5
= control target key start
LH: loop header
LB: loop body
LE: loop exit
PB: predicated region body
PF: predicated region fallthrough
CT: control target
= control target key end

     0   :  { %s672_s12 = smov 0   ;;  %s674_s13 = smov 0   ;;  %s741_s0 = inlined_call_operand.vmem [shape: bf16[54,1024], index: 0, kind: input, shape index: {}]   ;;  %s742_s1 = inlined_call_operand.vmem [shape: bf16[4,54], index: 1, kind: input, shape index: {}]   ;;  %s743_s2 = inlined_call_operand.vmem [shape: f32[4,1024], index: 2, kind: output, shape index: {0}]   ;;  %s744_s3 = inlined_call_operand.vmem [shape: f32[2,4,2], index: 3, kind: output, shape index: {1}]  }
   0x1   :  { %s676_s14 = smov 0  }
   0x2 LB: > { %s688_s15 = sadd.s32 4294967295, %s649_s14   ;;  %s691_s16 = sadd.s32 1, %s649_s14   ;;  %s649_s14 = sphi %s676_s14, %s747_s14   ;;  %s645_s13 = sphi %s674_s13, %s746_s13   ;;  %s641_s12 = sphi %s672_s12, %s745_s12  }
   0x3   : > { %s18_s17 = ssub.s32 %s649_s14, %s691_s16  ;;  %s21_s18 = sadd.s32 1, %s645_s13 }
   0x4   : > { %p19_p0 = scmp.eq.s32.totalorder %s18_s17, 0  ;;  %p28_p1 = scmp.ne.s32.totalorder %s645_s13, %s641_s12 }
   0x5   : > { %p29_p2 = scmp.eq.s32.totalorder %s649_s14, 0  ;;  %p548_p4 = scmp.ge.s32.totalorder %s649_s14, 2 }
   0x6   : > { %s700_s19 = scalar_select %p19_p0, %s645_s13, %s21_s18  }
   0x7   : > { %p30_p3 = por %p29_p2, %p28_p1  ;;  %130 = sbr.rel (%p548_p4) target bundleno = 25 (0x19), region = 20 }
   0xe   : > { %133 = sbr.rel (!%p30_p3) target bundleno = 25 (0x19), region = 24  ;;  %s135_s20 = sand.u32 (%p30_p3), 1, %s645_s13  }
   0xf   : > { %s577_s21 = sshll.u32 (%p30_p3), %s649_s14, 4  ;;  %s578_s22 = smul.u32 (%p30_p3), 112, %s135_s20 }
  0x10   : > { %s140_s25 = scalar_lea.vmem (%p30_p3), %s741_s0, %s577_s21 }
  0x11   : > { %v153_v0 = vld [vmem:[%s140_s25] sm:$0xff] (%p30_p3)  ;;  %v155_v1 = vld [vmem:[%s140_s25 + $0x8] sm:$0xff] (%p30_p3)  ;;  %s137_s26 = scalar_lea.vmem (%p30_p3), [#allocation2], %s578_s22 }
  0x12   : > { %v157_v2 = vld [vmem:[%s140_s25 + $0x20] sm:$0xff] (%p30_p3)  ;;  %v159_v3 = vld [vmem:[%s140_s25 + $0x28] sm:$0xff] (%p30_p3)  ;;  %154 = vst [vmem:[%s137_s26] sm:$0xff] (%p30_p3), %v153_v0  ;;  %156 = vst [vmem:[%s137_s26 + $0x8] sm:$0xff] (%p30_p3), %v155_v1 }
  0x13   : > { %v161_v4 = vld [vmem:[%s140_s25 + $0x40] sm:$0xff] (%p30_p3)  ;;  %v163_v5 = vld [vmem:[%s140_s25 + $0x48] sm:$0xff] (%p30_p3)  ;;  %158 = vst [vmem:[%s137_s26 + $0x10] sm:$0xff] (%p30_p3), %v157_v2  ;;  %160 = vst [vmem:[%s137_s26 + $0x18] sm:$0xff] (%p30_p3), %v159_v3 }
  0x14   : > { %162 = vst [vmem:[%s137_s26 + $0x20] sm:$0xff] (%p30_p3), %v161_v4  ;;  %164 = vst [vmem:[%s137_s26 + $0x28] sm:$0xff] (%p30_p3), %v163_v5  ;;  %v165_v6 = vld [vmem:[%s140_s25 + $0x60] sm:$0xff] (%p30_p3)  ;;  %v167_v7 = vld [vmem:[%s140_s25 + $0x68] sm:$0xff] (%p30_p3) }
  0x15   : > { %v169_v8 = vld [vmem:[%s140_s25 + $0x80] sm:$0xff]  ;;  %166 = vst [vmem:[%s137_s26 + $0x30] sm:$0xff] %v165_v6  ;;  %168 = vst [vmem:[%s137_s26 + $0x38] sm:$0xff] %v167_v7  ;;  %v171_v9 = vld [vmem:[%s140_s25 + $0x88] sm:$0xff] }
  0x16   : > { %170 = vst [vmem:[%s137_s26 + $0x40] sm:$0xff] %v169_v8  ;;  %v173_v10 = vld [vmem:[%s140_s25 + $0xa0] sm:$0xff]  ;;  %v175_v11 = vld [vmem:[%s140_s25 + $0xa8] sm:$0xff]  ;;  %172 = vst [vmem:[%s137_s26 + $0x48] sm:$0xff] %v171_v9 }
  0x17   : > { %174 = vst [vmem:[%s137_s26 + $0x50] sm:$0xff] %v173_v10  ;;  %176 = vst [vmem:[%s137_s26 + $0x58] sm:$0xff] %v175_v11  ;;  %v177_v12 = vld [vmem:[%s140_s25 + $0xc0] sm:$0xff]  ;;  %v179_v13 = vld [vmem:[%s140_s25 + $0xc8] sm:$0xff] }
  0x18   : > { %178 = vst [vmem:[%s137_s26 + $0x60] sm:$0xff] %v177_v12  ;;  %180 = vst [vmem:[%s137_s26 + $0x68] sm:$0xff] %v179_v13 }
  0x19 PF: > { %p551_p5 = scmp.ge.s32.totalorder %s649_s14, 1  ;;  %p185_p6 = scmp.lt.s32.totalorder %s649_s14, 3 }
  0x1b   : > { %p186_p7 = pnand %p551_p5, %p185_p6 }
  0x1c   : > { %s192_s27 = sand.u32 (!%p186_p7), 1, %s641_s12   ;;  %v651_v14 = vmov (!%p186_p7), 0   ;;  %vm320_vm0 = vcmask (!%p186_p7), 1042432   ;;  %v231_v35 = vld [vmem:[%s742_s1] sm:$0x3] (!%p186_p7)  ;;  %vm316_vm1 = vcmask (!%p186_p7), 441344  }
  0x1d   : > { %189 = sbr.rel (%p186_p7) target bundleno = 418 (0x1a2), region = 47  ;;  %365 = vmatprep.mubr.bf16.mxu0 (!%p186_p7), %v651_v14  ;;  %406 = vmatprep.mubr.bf16.mxu1 (!%p186_p7), %v651_v14  ;;  %s552_s5 = sshll.u32 (!%p186_p7), %s688_s15, 2  ;;  %vm425_vm2 = vcmask (!%p186_p7), 1043456   ;;  %vm448_vm3 = vcmask (!%p186_p7), 7168   ;;  %vm450_vm4 = vcmask (!%p186_p7), 11264  }
  0x1e   : > { %s579_s28 = smul.u32 (!%p186_p7), 112, %s192_s27  ;;  %p221_p8 = scmp.lt.s32.totalorder (!%p186_p7), %s552_s5, 7 }
  0x1f   : > { %p226_p9 = scmp.lt.s32.totalorder (!%p186_p7), %s688_s15, 1 }
  0x20   : > { %s194_s29 = scalar_lea.vmem (!%p186_p7), [#allocation2], %s579_s28 }
  0x21   : > { %v605_v15 = vld [vmem:[%s194_s29 + $0x4] ss:$16 sps:$4 sm:$0xff] (!%p186_p7)   ;;  %v607_v16 = vld [vmem:[%s194_s29 + $0xc] ss:$16 sps:$4 sm:$0xff] (!%p186_p7)   ;;  %v609_v17 = vld [vmem:[%s194_s29] ss:$16 sps:$4 sm:$0xff] (!%p186_p7)  }
  0x22   : > { %333 = vmatprep.subr.bf16.mxu0 (!%p186_p7), %v605_v15  ;;  %v610_v18 = vld [vmem:[%s194_s29 + $0x8] ss:$16 sps:$4 sm:$0xff] (!%p186_p7)   ;;  %374 = vmatprep.subr.bf16.mxu1 (!%p186_p7), %v607_v16  ;;  %v611_v19 = vld [vmem:[%s194_s29 + $0x24] ss:$16 sps:$4 sm:$0xff] (!%p186_p7)   ;;  %v613_v20 = vld [vmem:[%s194_s29 + $0x2c] ss:$16 sps:$4 sm:$0xff] (!%p186_p7)  }
  0x23   : > { %334 = vmatpush1.bf16.msra.mxu0 (!%p186_p7), %v609_v17  ;;  %375 = vmatpush1.bf16.msra.mxu1 (!%p186_p7), %v610_v18  ;;  %v615_v21 = vld [vmem:[%s194_s29 + $0x20] ss:$16 sps:$4 sm:$0xff] (!%p186_p7)   ;;  %v616_v22 = vld [vmem:[%s194_s29 + $0x28] ss:$16 sps:$4 sm:$0xff] (!%p186_p7)   ;;  %v617_v23 = vld [vmem:[%s194_s29 + $0x44] ss:$16 sps:$4 sm:$0xff] (!%p186_p7)  }
  0x24   : > { %335 = vmatprep.subr.bf16.mxu0 %v611_v19  ;;  %376 = vmatprep.subr.bf16.mxu1 %v613_v20  ;;  %v619_v24 = vld [vmem:[%s194_s29 + $0x4c] ss:$16 sps:$4 sm:$0xff]   ;;  %v621_v25 = vld [vmem:[%s194_s29 + $0x40] ss:$16 sps:$4 sm:$0xff]   ;;  %v622_v26 = vld [vmem:[%s194_s29 + $0x48] ss:$16 sps:$4 sm:$0xff]  }
  0x25   : > { %v244_v27 = vld [vmem:[%s194_s29 + $0x60] sm:$0x77]  ;;  %v245_v28 = vld [vmem:[%s194_s29 + $0x68] sm:$0x77]  ;;  %s749_s5 = smov (!%p221_p8, %s552_s5), 7  ;;  %s751_s15 = smov (!%p226_p9, %s688_s15), 1 }
  0x26   : > { %v568_v29 = vcombine.high %v244_v27, %v244_v27  ;;  %v570_v30 = vcombine.high %v245_v28, %v245_v28  ;;  %v567_v31 = vcombine.low %v244_v27, %v244_v27  ;;  %v569_v32 = vcombine.low %v245_v28, %v245_v28  ;;  %s553_s6 = sshll.u32 %s749_s5, 2  ;;  %s554_s10 = sshll.u32 %s751_s15, 2 }
  0x27   : > { %336 = vmatpush1.bf16.msra.mxu0 %v615_v21  ;;  %377 = vmatpush1.bf16.msra.mxu1 %v616_v22  ;;  %s224_s9 = scalar_lea.vmem %s743_s2, %s553_s6  ;;  %s229_s14 = scalar_lea.vmem %s744_s3, %s554_s10 }
  0x28   : > { %337 = vmatprep.subr.bf16.mxu0 %v617_v23  ;;  %378 = vmatprep.subr.bf16.mxu1 %v619_v24  ;;  %v322_v33 = vsel %vm320_vm0, %v567_v31, 0  ;;  %v328_v34 = vsel %vm320_vm0, %v569_v32, 0 }
  0x2b   : > { %338 = vmatpush1.bf16.msra.mxu0 %v621_v25  ;;  %379 = vmatpush1.bf16.msra.mxu1 %v622_v26 }
  0x2c   : > { %571 = vmatprep.subr.msk.bf16.mxu0 %vm320_vm0, %v568_v29  ;;  %573 = vmatprep.subr.msk.bf16.mxu1 %vm320_vm0, %v570_v30 }
  0x2f   : > { %340 = vmatpush1.bf16.msra.mxu0 %v322_v33  ;;  %381 = vmatpush1.bf16.msra.mxu1 %v328_v34 }
  0x32   : > { %572 = vmatmul.mubr.msk.bf16.vlgmr.msra.gmra.mrb[0].mxu0 %vm316_vm1, %v231_v35  ;;  %574 = vmatmul.mubr.msk.bf16.vlgmr.msra.gmra.mrb[0].mxu1 %vm316_vm1, %v231_v35 }
 0x105   : > { %v367_v36 = vpop.f32.mrb[0].mxu0  ;;  %v408_v37 = vpop.f32.mrb[0].mxu1 }
 0x106   : > { %v426_v38 = vsel %vm425_vm2, %v367_v36, 0.0  ;;  %v435_v39 = vmul.f32 %v367_v36, %v367_v36  ;;  %v437_v40 = vmul.f32 %v408_v37, %v408_v37  ;;  %v369_v41 = vpop.f32.mrb[1].mxu0  ;;  %v410_v42 = vpop.f32.mrb[1].mxu1  ;;  %v429_v43 = vsel %vm425_vm2, %v408_v37, 0.0 }
 0x107   : > { %v419_v44 = vcombine.low %v367_v36, %v369_v41  ;;  %v427_v45 = vsel %vm425_vm2, %v369_v41, 0.0  ;;  %v436_v46 = vmul.f32 %v369_v41, %v369_v41  ;;  %v420_v47 = vcombine.low %v408_v37, %v410_v42  ;;  %v371_v48 = vpop.f32.mrb[2].mxu0  ;;  %v412_v49 = vpop.f32.mrb[2].mxu1 }
 0x108   : > { %v439_v50 = vsel %vm425_vm2, %v435_v39, 0.0  ;;  %v372_v51 = vpop.f32.mrb[3].mxu0  ;;  %v413_v52 = vpop.f32.mrb[3].mxu1  ;;  %v428_v53 = vadd.f32 %v427_v45, %v426_v38  ;;  %v438_v55 = vmul.f32 %v410_v42, %v410_v42  ;;  %v442_v56 = vsel %vm425_vm2, %v437_v40, 0.0 }
 0x109   : > { %423 = vst [vmem:[%s224_s9] sm:$0xff] %v419_v44  ;;  %v440_v54 = vsel %vm425_vm2, %v436_v46, 0.0  ;;  %424 = vst [vmem:[%s224_s9 + $0x8] sm:$0xff] %v420_v47  ;;  %v431_v59 = vsel %vm425_vm2, %v410_v42, 0.0 }
 0x10a   : > { %v430_v57 = vadd.f32 %v429_v43, %v428_v53  ;;  %v441_v58 = vadd.f32 %v440_v54, %v439_v50  ;;  %v444_v62 = vsel %vm425_vm2, %v438_v55, 0.0 }
 0x10c   : > { %v432_v60 = vadd.f32 %v431_v59, %v430_v57  ;;  %v443_v61 = vadd.f32 %v442_v56, %v441_v58 }
 0x10e   : > { %433 = vadd.xlane.f32.xlu0 %v432_v60  ;;  %v445_v63 = vadd.f32 %v444_v62, %v443_v61 }
 0x112   : > { %446 = vadd.xlane.f32.xlu0 %v445_v63 }
 0x19b   : > { %v434_v0 = vpop.xlane.xlu0 %433 }
 0x19f   : > { %v447_v1 = vpop.xlane.xlu0 %446 }
 0x1a0   : > { %v449_v2 = vsel %vm448_vm3, %v434_v0, %v447_v1 }
 0x1a1   : > { %451 = vst.msk [vmem:[%s229_s14] sm:$0xf] %vm450_vm4, %v449_v2 }
 0x1a2 PF: > { %p11_p10 = scmp.ge.s32.totalorder %s691_s16, 4   ;;  %s745_s12 = smov %s645_s13 }
 0x1a3   : > { %s746_s13 = smov %s700_s19  ;;  %s747_s14 = smov %s691_s16 }
 0x1a4   :  { %13 = sbr.rel (!%p11_p10) target bundleno = 2 (0x2), region = 98 }

// kernel: down_transition.6
= control target key start
LH: loop header
LB: loop body
LE: loop exit
PB: predicated region body
PF: predicated region fallthrough
CT: control target
= control target key end

     0   :  { %s318_s12 = smov 0   ;;  %s341_s0 = inlined_call_operand.vmem [shape: f32[4,1024], index: 0, kind: input, shape index: {}]   ;;  %s342_s1 = inlined_call_operand.vmem [shape: f32[4,1], index: 1, kind: input, shape index: {}]   ;;  %s343_s2 = inlined_call_operand.vmem [shape: f32[4,1], index: 2, kind: input, shape index: {}]   ;;  %s344_s3 = inlined_call_operand.vmem [shape: f32[4,1024], index: 3, kind: output, shape index: {}]  }
   0x1 LB: > { %s266_s13 = sadd.s32 4294967295, %s294_s12   ;;  %p270_p0 = scmp.ge.s32.totalorder %s294_s12, 1  ;;  %s294_s12 = sphi %s318_s12, %s13_s12  }
   0x2   : > { %p138_p1 = scmp.lt.s32.totalorder %s294_s12, 3 }
   0x4   : > { %p139_p2 = pnand %p270_p0, %p138_p1 }
   0x5   : > { %v176_v0 = vld [vmem:[%s342_s1] sm:$0xf] (!%p139_p2)  ;;  %v296_v1 = vmov (!%p139_p2), 0   ;;  %s271_s18 = sshll.u32 (!%p139_p2), %s266_s13, 2  ;;  %v297_v3 = vmov (!%p139_p2), 839922192   ;;  %v184_v5 = vlaneseq (!%p139_p2) }
   0x6   : > { %142 = sbr.rel (%p139_p2) target bundleno = 146 (0x92), region = 32  ;;  %287 = vset.pattern.permute.xlu0 (!%p139_p2), %v296_v1  ;;  %v191_v2 = vld [vmem:[%s343_s2] sm:$0xf] (!%p139_p2)  ;;  %p163_p3 = scmp.lt.s32.totalorder (!%p139_p2), %s271_s18, 7  ;;  %v182_v4 = vunpack.c.l.s4 (!%p139_p2), %v297_v3 }
   0x7   : > { %179 = vperm.xlu0 (!%p139_p2), %287, %v176_v0   ;;  %v185_v7 = vshrl.u32 (!%p139_p2), %v184_v5, 7 }
   0x8   : > { %v183_v6 = vunpack.c.0.s8 (!%p139_p2), %v182_v4 }
   0xa   : > { %v186_v8 = vsub.s32 (!%p139_p2), %v183_v6, %v185_v7 }
   0xb   : > { %194 = vperm.xlu0 (!%p139_p2), %287, %v191_v2  }
   0xd   : > { %s346_s18 = smov (!%p163_p3, %s271_s18), 7 }
   0xe   : > { %s272_s19 = sshll.u32 %s346_s18, 2 }
   0xf   : > { %s166_s22 = scalar_lea.vmem %s341_s0, %s272_s19  ;;  %s172_s25 = scalar_lea.vmem %s344_s3, %s272_s19 }
  0x10   : > { %v174_v11 = vld [vmem:[%s166_s22] sm:$0xff]  ;;  %v175_v12 = vld [vmem:[%s166_s22 + $0x8] sm:$0xff] }
  0x86   : > { %v180_v9 = vpop.permute.xlu0 %179 }
  0x87   : > { %v187_v10 = vrot.slane %v180_v9, %v186_v8 }
  0x89   : > { %v189_v14 = vmul.f32 %v187_v10, %v174_v11  ;;  %v190_v15 = vmul.f32 %v187_v10, %v175_v12 }
  0x8a   : > { %v195_v13 = vpop.permute.xlu0 %194 }
  0x8b   : > { %v202_v16 = vrot.slane %v195_v13, %v186_v8 }
  0x8d   : > { %v204_v17 = vadd.f32 %v202_v16, %v189_v14  ;;  %v205_v18 = vadd.f32 %v202_v16, %v190_v15 }
  0x8f   : > { %v206_v19 = vmax.f32 %v204_v17, 0.0  ;;  %v207_v20 = vmax.f32 %v205_v18, 0.0 }
  0x91   : > { %208 = vst [vmem:[%s172_s25] sm:$0xff] %v206_v19  ;;  %209 = vst [vmem:[%s172_s25 + $0x8] sm:$0xff] %v207_v20 }
  0x92 PF: > { %s13_s12 = sadd.s32 1, %s294_s12  }
  0x93   : > { %p10_p4 = scmp.ge.s32.totalorder %s13_s12, 4  }
  0x95   :  { %12 = sbr.rel (!%p10_p4) target bundleno = 1 (0x1), region = 62 }

// kernel: down_transition.7
= control target key start
LH: loop header
LB: loop body
LE: loop exit
PB: predicated region body
PF: predicated region fallthrough
CT: control target
= control target key end

     0   :  { %s812_s12 = smov 0   ;;  %s814_s13 = smov 0   ;;  %s971_s0 = inlined_call_operand.vmem [shape: bf16[108,1024], index: 0, kind: input, shape index: {}]   ;;  %s972_s1 = inlined_call_operand.vmem [shape: bf16[4,108], index: 1, kind: input, shape index: {}]   ;;  %s973_s2 = inlined_call_operand.vmem [shape: f32[4,1024], index: 2, kind: output, shape index: {0}]   ;;  %s974_s3 = inlined_call_operand.vmem [shape: f32[2,4,2], index: 3, kind: output, shape index: {1}]  }
   0x1   :  { %s816_s14 = smov 0  }
   0x2 LB: > { %s828_s15 = sadd.s32 4294967295, %s789_s14   ;;  %s831_s16 = sadd.s32 1, %s789_s14   ;;  %s789_s14 = sphi %s816_s14, %s977_s14   ;;  %s785_s13 = sphi %s814_s13, %s976_s13   ;;  %s781_s12 = sphi %s812_s12, %s975_s12  }
   0x3   : > { %s18_s17 = ssub.s32 %s789_s14, %s831_s16  ;;  %s21_s18 = sadd.s32 1, %s785_s13 }
   0x4   : > { %p19_p0 = scmp.eq.s32.totalorder %s18_s17, 0  ;;  %p28_p1 = scmp.ne.s32.totalorder %s785_s13, %s781_s12 }
   0x5   : > { %p29_p2 = scmp.eq.s32.totalorder %s789_s14, 0  ;;  %p656_p4 = scmp.ge.s32.totalorder %s789_s14, 2 }
   0x6   : > { %s840_s19 = scalar_select %p19_p0, %s785_s13, %s21_s18  }
   0x7   : > { %p30_p3 = por %p29_p2, %p28_p1  ;;  %130 = sbr.rel (%p656_p4) target bundleno = 32 (0x20), region = 20 }
   0xe   : > { %133 = sbr.rel (!%p30_p3) target bundleno = 32 (0x20), region = 24  ;;  %s135_s20 = sand.u32 (%p30_p3), 1, %s785_s13  }
   0xf   : > { %s697_s21 = sshll.u32 (%p30_p3), %s789_s14, 4  ;;  %s698_s22 = smul.u32 (%p30_p3), 224, %s135_s20 }
  0x10   : > { %s848_s25 = scalar_lea.vmem (%p30_p3), %s971_s0, %s697_s21 }
  0x11   : > { %v153_v0 = vld [vmem:[%s848_s25] sm:$0xff] (%p30_p3)  ;;  %v155_v1 = vld [vmem:[%s848_s25 + $0x8] sm:$0xff] (%p30_p3)  ;;  %s856_s26 = scalar_lea.vmem (%p30_p3), [#allocation2], %s698_s22 }
  0x12   : > { %v157_v2 = vld [vmem:[%s848_s25 + $0x20] sm:$0xff] (%p30_p3)  ;;  %v159_v3 = vld [vmem:[%s848_s25 + $0x28] sm:$0xff] (%p30_p3)  ;;  %154 = vst [vmem:[%s856_s26] sm:$0xff] (%p30_p3), %v153_v0  ;;  %156 = vst [vmem:[%s856_s26 + $0x8] sm:$0xff] (%p30_p3), %v155_v1 }
  0x13   : > { %v161_v4 = vld [vmem:[%s848_s25 + $0x40] sm:$0xff] (%p30_p3)  ;;  %v163_v5 = vld [vmem:[%s848_s25 + $0x48] sm:$0xff] (%p30_p3)  ;;  %158 = vst [vmem:[%s856_s26 + $0x10] sm:$0xff] (%p30_p3), %v157_v2  ;;  %160 = vst [vmem:[%s856_s26 + $0x18] sm:$0xff] (%p30_p3), %v159_v3 }
  0x14   : > { %162 = vst [vmem:[%s856_s26 + $0x20] sm:$0xff] (%p30_p3), %v161_v4  ;;  %164 = vst [vmem:[%s856_s26 + $0x28] sm:$0xff] (%p30_p3), %v163_v5  ;;  %v165_v6 = vld [vmem:[%s848_s25 + $0x60] sm:$0xff] (%p30_p3)  ;;  %v167_v7 = vld [vmem:[%s848_s25 + $0x68] sm:$0xff] (%p30_p3) }
  0x15   : > { %v169_v8 = vld [vmem:[%s848_s25 + $0x80] sm:$0xff]  ;;  %166 = vst [vmem:[%s856_s26 + $0x30] sm:$0xff] %v165_v6  ;;  %168 = vst [vmem:[%s856_s26 + $0x38] sm:$0xff] %v167_v7  ;;  %v171_v9 = vld [vmem:[%s848_s25 + $0x88] sm:$0xff] }
  0x16   : > { %170 = vst [vmem:[%s856_s26 + $0x40] sm:$0xff] %v169_v8  ;;  %v173_v10 = vld [vmem:[%s848_s25 + $0xa0] sm:$0xff]  ;;  %v175_v11 = vld [vmem:[%s848_s25 + $0xa8] sm:$0xff]  ;;  %172 = vst [vmem:[%s856_s26 + $0x48] sm:$0xff] %v171_v9 }
  0x17   : > { %174 = vst [vmem:[%s856_s26 + $0x50] sm:$0xff] %v173_v10  ;;  %176 = vst [vmem:[%s856_s26 + $0x58] sm:$0xff] %v175_v11  ;;  %v177_v12 = vld [vmem:[%s848_s25 + $0xc0] sm:$0xff]  ;;  %v179_v13 = vld [vmem:[%s848_s25 + $0xc8] sm:$0xff] }
  0x18   : > { %v181_v14 = vld [vmem:[%s848_s25 + $0xe0] sm:$0xff]  ;;  %178 = vst [vmem:[%s856_s26 + $0x60] sm:$0xff] %v177_v12  ;;  %180 = vst [vmem:[%s856_s26 + $0x68] sm:$0xff] %v179_v13  ;;  %v183_v15 = vld [vmem:[%s848_s25 + $0xe8] sm:$0xff] }
  0x19   : > { %182 = vst [vmem:[%s856_s26 + $0x70] sm:$0xff] %v181_v14  ;;  %v185_v16 = vld [vmem:[%s848_s25 + $0x100] sm:$0xff]  ;;  %v187_v17 = vld [vmem:[%s848_s25 + $0x108] sm:$0xff]  ;;  %184 = vst [vmem:[%s856_s26 + $0x78] sm:$0xff] %v183_v15 }
  0x1a   : > { %186 = vst [vmem:[%s856_s26 + $0x80] sm:$0xff] %v185_v16  ;;  %188 = vst [vmem:[%s856_s26 + $0x88] sm:$0xff] %v187_v17  ;;  %v189_v18 = vld [vmem:[%s848_s25 + $0x120] sm:$0xff]  ;;  %v191_v19 = vld [vmem:[%s848_s25 + $0x128] sm:$0xff] }
  0x1b   : > { %v193_v20 = vld [vmem:[%s848_s25 + $0x140] sm:$0xff]  ;;  %190 = vst [vmem:[%s856_s26 + $0x90] sm:$0xff] %v189_v18  ;;  %192 = vst [vmem:[%s856_s26 + $0x98] sm:$0xff] %v191_v19  ;;  %v195_v21 = vld [vmem:[%s848_s25 + $0x148] sm:$0xff] }
  0x1c   : > { %194 = vst [vmem:[%s856_s26 + $0xa0] sm:$0xff] %v193_v20  ;;  %v197_v22 = vld [vmem:[%s848_s25 + $0x160] sm:$0xff]  ;;  %v199_v23 = vld [vmem:[%s848_s25 + $0x168] sm:$0xff]  ;;  %196 = vst [vmem:[%s856_s26 + $0xa8] sm:$0xff] %v195_v21 }
  0x1d   : > { %198 = vst [vmem:[%s856_s26 + $0xb0] sm:$0xff] %v197_v22  ;;  %200 = vst [vmem:[%s856_s26 + $0xb8] sm:$0xff] %v199_v23  ;;  %v201_v24 = vld [vmem:[%s848_s25 + $0x180] sm:$0xff]  ;;  %v203_v25 = vld [vmem:[%s848_s25 + $0x188] sm:$0xff] }
  0x1e   : > { %v205_v26 = vld [vmem:[%s848_s25 + $0x1a0] sm:$0xff]  ;;  %202 = vst [vmem:[%s856_s26 + $0xc0] sm:$0xff] %v201_v24  ;;  %204 = vst [vmem:[%s856_s26 + $0xc8] sm:$0xff] %v203_v25  ;;  %v207_v27 = vld [vmem:[%s848_s25 + $0x1a8] sm:$0xff] }
  0x1f   : > { %206 = vst [vmem:[%s856_s26 + $0xd0] sm:$0xff] %v205_v26  ;;  %208 = vst [vmem:[%s856_s26 + $0xd8] sm:$0xff] %v207_v27 }
  0x20 PF: > { %p659_p5 = scmp.ge.s32.totalorder %s789_s14, 1  ;;  %p213_p6 = scmp.lt.s32.totalorder %s789_s14, 3 }
  0x22   : > { %p214_p7 = pnand %p659_p5, %p213_p6 }
  0x23   : > { %s220_s27 = sand.u32 (!%p214_p7), 1, %s781_s12   ;;  %v791_v28 = vmov (!%p214_p7), 0   ;;  %vm428_vm0 = vcmask (!%p214_p7), 1045504   ;;  %v259_v59 = vld [vmem:[%s972_s1] sm:$0x3] (!%p214_p7)  ;;  %vm424_vm1 = vcmask (!%p214_p7), 883712  }
  0x24   : > { %217 = sbr.rel (%p214_p7) target bundleno = 437 (0x1b5), region = 47  ;;  %473 = vmatprep.mubr.bf16.mxu0 (!%p214_p7), %v791_v28  ;;  %514 = vmatprep.mubr.bf16.mxu1 (!%p214_p7), %v791_v28  ;;  %s660_s5 = sshll.u32 (!%p214_p7), %s828_s15, 2  ;;  %vm533_vm2 = vcmask (!%p214_p7), 1043456   ;;  %vm556_vm3 = vcmask (!%p214_p7), 7168   ;;  %vm558_vm4 = vcmask (!%p214_p7), 11264  }
  0x25   : > { %s699_s28 = smul.u32 (!%p214_p7), 224, %s220_s27  ;;  %p249_p8 = scmp.lt.s32.totalorder (!%p214_p7), %s660_s5, 7 }
  0x26   : > { %p254_p9 = scmp.lt.s32.totalorder (!%p214_p7), %s828_s15, 1 }
  0x27   : > { %s911_s29 = scalar_lea.vmem (!%p214_p7), [#allocation2], %s699_s28 }
  0x28   : > { %v725_v29 = vld [vmem:[%s911_s29 + $0x4] ss:$16 sps:$4 sm:$0xff] (!%p214_p7)   ;;  %v727_v30 = vld [vmem:[%s911_s29 + $0xc] ss:$16 sps:$4 sm:$0xff] (!%p214_p7)   ;;  %v729_v31 = vld [vmem:[%s911_s29] ss:$16 sps:$4 sm:$0xff] (!%p214_p7)  }
  0x29   : > { %441 = vmatprep.subr.bf16.mxu0 (!%p214_p7), %v725_v29  ;;  %v730_v32 = vld [vmem:[%s911_s29 + $0x8] ss:$16 sps:$4 sm:$0xff] (!%p214_p7)   ;;  %482 = vmatprep.subr.bf16.mxu1 (!%p214_p7), %v727_v30  ;;  %v731_v33 = vld [vmem:[%s911_s29 + $0x24] ss:$16 sps:$4 sm:$0xff] (!%p214_p7)   ;;  %v733_v34 = vld [vmem:[%s911_s29 + $0x2c] ss:$16 sps:$4 sm:$0xff] (!%p214_p7)  }
  0x2a   : > { %442 = vmatpush1.bf16.msra.mxu0 (!%p214_p7), %v729_v31  ;;  %483 = vmatpush1.bf16.msra.mxu1 (!%p214_p7), %v730_v32  ;;  %v735_v35 = vld [vmem:[%s911_s29 + $0x20] ss:$16 sps:$4 sm:$0xff] (!%p214_p7)   ;;  %v736_v36 = vld [vmem:[%s911_s29 + $0x28] ss:$16 sps:$4 sm:$0xff] (!%p214_p7)   ;;  %v737_v37 = vld [vmem:[%s911_s29 + $0x44] ss:$16 sps:$4 sm:$0xff] (!%p214_p7)  }
  0x2b   : > { %443 = vmatprep.subr.bf16.mxu0 %v731_v33  ;;  %484 = vmatprep.subr.bf16.mxu1 %v733_v34  ;;  %v739_v38 = vld [vmem:[%s911_s29 + $0x4c] ss:$16 sps:$4 sm:$0xff]   ;;  %v741_v39 = vld [vmem:[%s911_s29 + $0x40] ss:$16 sps:$4 sm:$0xff]   ;;  %v742_v40 = vld [vmem:[%s911_s29 + $0x48] ss:$16 sps:$4 sm:$0xff]  }
  0x2c   : > { %v743_v41 = vld [vmem:[%s911_s29 + $0x64] ss:$16 sps:$4 sm:$0xff]   ;;  %v745_v42 = vld [vmem:[%s911_s29 + $0x6c] ss:$16 sps:$4 sm:$0xff]   ;;  %v747_v43 = vld [vmem:[%s911_s29 + $0x60] ss:$16 sps:$4 sm:$0xff]  }
  0x2d   : > { %v748_v44 = vld [vmem:[%s911_s29 + $0x68] ss:$16 sps:$4 sm:$0xff]   ;;  %v749_v45 = vld [vmem:[%s911_s29 + $0x84] ss:$16 sps:$4 sm:$0xff]   ;;  %v751_v46 = vld [vmem:[%s911_s29 + $0x8c] ss:$16 sps:$4 sm:$0xff]  }
  0x2e   : > { %444 = vmatpush1.bf16.msra.mxu0 %v735_v35  ;;  %485 = vmatpush1.bf16.msra.mxu1 %v736_v36  ;;  %v753_v47 = vld [vmem:[%s911_s29 + $0x80] ss:$16 sps:$4 sm:$0xff]   ;;  %v754_v48 = vld [vmem:[%s911_s29 + $0x88] ss:$16 sps:$4 sm:$0xff]   ;;  %v755_v49 = vld [vmem:[%s911_s29 + $0xa4] ss:$16 sps:$4 sm:$0xff]  }
  0x2f   : > { %445 = vmatprep.subr.bf16.mxu0 %v737_v37  ;;  %486 = vmatprep.subr.bf16.mxu1 %v739_v38  ;;  %v757_v50 = vld [vmem:[%s911_s29 + $0xac] ss:$16 sps:$4 sm:$0xff]   ;;  %v759_v51 = vld [vmem:[%s911_s29 + $0xa0] ss:$16 sps:$4 sm:$0xff]   ;;  %v760_v52 = vld [vmem:[%s911_s29 + $0xa8] ss:$16 sps:$4 sm:$0xff]  }
  0x30   : > { %v761_v53 = vld [vmem:[%s911_s29 + $0xc4] ss:$16 sps:$4 sm:$0x3f]   ;;  %v763_v54 = vld [vmem:[%s911_s29 + $0xcc] ss:$16 sps:$4 sm:$0x3f]  }
  0x31   : > { %v765_v55 = vld [vmem:[%s911_s29 + $0xc0] ss:$16 sps:$4 sm:$0x3f]   ;;  %v766_v56 = vld [vmem:[%s911_s29 + $0xc8] ss:$16 sps:$4 sm:$0x3f]  }
  0x32   : > { %446 = vmatpush1.bf16.msra.mxu0 %v741_v39  ;;  %487 = vmatpush1.bf16.msra.mxu1 %v742_v40  ;;  %v430_v57 = vsel %vm428_vm0, %v765_v55, 0  ;;  %v436_v58 = vsel %vm428_vm0, %v766_v56, 0  ;;  %s979_s5 = smov (!%p249_p8, %s660_s5), 7  ;;  %s981_s15 = smov (!%p254_p9, %s828_s15), 1 }
  0x33   : > { %447 = vmatprep.subr.bf16.mxu0 %v743_v41  ;;  %488 = vmatprep.subr.bf16.mxu1 %v745_v42  ;;  %s661_s6 = sshll.u32 %s979_s5, 2  ;;  %s662_s10 = sshll.u32 %s981_s15, 2 }
  0x34   : > { %s252_s9 = scalar_lea.vmem %s973_s2, %s661_s6  ;;  %s257_s14 = scalar_lea.vmem %s974_s3, %s662_s10 }
  0x36   : > { %448 = vmatpush1.bf16.msra.mxu0 %v747_v43  ;;  %489 = vmatpush1.bf16.msra.mxu1 %v748_v44 }
  0x37   : > { %449 = vmatprep.subr.bf16.mxu0 %v749_v45  ;;  %490 = vmatprep.subr.bf16.mxu1 %v751_v46 }
  0x3a   : > { %450 = vmatpush1.bf16.msra.mxu0 %v753_v47  ;;  %491 = vmatpush1.bf16.msra.mxu1 %v754_v48 }
  0x3b   : > { %451 = vmatprep.subr.bf16.mxu0 %v755_v49  ;;  %492 = vmatprep.subr.bf16.mxu1 %v757_v50 }
  0x3e   : > { %452 = vmatpush1.bf16.msra.mxu0 %v759_v51  ;;  %493 = vmatpush1.bf16.msra.mxu1 %v760_v52 }
  0x3f   : > { %691 = vmatprep.subr.msk.bf16.mxu0 %vm428_vm0, %v761_v53  ;;  %693 = vmatprep.subr.msk.bf16.mxu1 %vm428_vm0, %v763_v54 }
  0x42   : > { %454 = vmatpush1.bf16.msra.mxu0 %v430_v57  ;;  %495 = vmatpush1.bf16.msra.mxu1 %v436_v58 }
  0x45   : > { %692 = vmatmul.mubr.msk.bf16.vlgmr.msra.gmra.mrb[0].mxu0 %vm424_vm1, %v259_v59  ;;  %694 = vmatmul.mubr.msk.bf16.vlgmr.msra.gmra.mrb[0].mxu1 %vm424_vm1, %v259_v59 }
 0x118   : > { %v475_v60 = vpop.f32.mrb[0].mxu0  ;;  %v516_v61 = vpop.f32.mrb[0].mxu1 }
 0x119   : > { %v534_v62 = vsel %vm533_vm2, %v475_v60, 0.0  ;;  %v543_v63 = vmul.f32 %v475_v60, %v475_v60  ;;  %v545_v0 = vmul.f32 %v516_v61, %v516_v61  ;;  %v477_v1 = vpop.f32.mrb[1].mxu0  ;;  %v518_v2 = vpop.f32.mrb[1].mxu1  ;;  %v537_v3 = vsel %vm533_vm2, %v516_v61, 0.0 }
 0x11a   : > { %v527_v4 = vcombine.low %v475_v60, %v477_v1  ;;  %v535_v5 = vsel %vm533_vm2, %v477_v1, 0.0  ;;  %v544_v6 = vmul.f32 %v477_v1, %v477_v1  ;;  %v528_v7 = vcombine.low %v516_v61, %v518_v2  ;;  %v479_v8 = vpop.f32.mrb[2].mxu0  ;;  %v520_v9 = vpop.f32.mrb[2].mxu1 }
 0x11b   : > { %v547_v10 = vsel %vm533_vm2, %v543_v63, 0.0  ;;  %v480_v11 = vpop.f32.mrb[3].mxu0  ;;  %v521_v12 = vpop.f32.mrb[3].mxu1  ;;  %v536_v13 = vadd.f32 %v535_v5, %v534_v62  ;;  %v546_v15 = vmul.f32 %v518_v2, %v518_v2  ;;  %v550_v16 = vsel %vm533_vm2, %v545_v0, 0.0 }
 0x11c   : > { %531 = vst [vmem:[%s252_s9] sm:$0xff] %v527_v4  ;;  %v548_v14 = vsel %vm533_vm2, %v544_v6, 0.0  ;;  %532 = vst [vmem:[%s252_s9 + $0x8] sm:$0xff] %v528_v7  ;;  %v539_v19 = vsel %vm533_vm2, %v518_v2, 0.0 }
 0x11d   : > { %v538_v17 = vadd.f32 %v537_v3, %v536_v13  ;;  %v549_v18 = vadd.f32 %v548_v14, %v547_v10  ;;  %v552_v22 = vsel %vm533_vm2, %v546_v15, 0.0 }
 0x11f   : > { %v540_v20 = vadd.f32 %v539_v19, %v538_v17  ;;  %v551_v21 = vadd.f32 %v550_v16, %v549_v18 }
 0x121   : > { %541 = vadd.xlane.f32.xlu0 %v540_v20  ;;  %v553_v23 = vadd.f32 %v552_v22, %v551_v21 }
 0x125   : > { %554 = vadd.xlane.f32.xlu0 %v553_v23 }
 0x1ae   : > { %v542_v24 = vpop.xlane.xlu0 %541 }
 0x1b2   : > { %v555_v25 = vpop.xlane.xlu0 %554 }
 0x1b3   : > { %v557_v26 = vsel %vm556_vm3, %v542_v24, %v555_v25 }
 0x1b4   : > { %559 = vst.msk [vmem:[%s257_s14] sm:$0xf] %vm558_vm4, %v557_v26 }
 0x1b5 PF: > { %p11_p10 = scmp.ge.s32.totalorder %s831_s16, 4   ;;  %s975_s12 = smov %s785_s13 }
 0x1b6   : > { %s976_s13 = smov %s840_s19  ;;  %s977_s14 = smov %s831_s16 }
 0x1b7   :  { %13 = sbr.rel (!%p11_p10) target bundleno = 2 (0x2), region = 98 }

// kernel: down_transition.9
= control target key start
LH: loop header
LB: loop body
LE: loop exit
PB: predicated region body
PF: predicated region fallthrough
CT: control target
= control target key end

     0   :  { %s556_s6 = smov 0   ;;  %s558_s7 = smov 0   ;;  %s675_s0 = inlined_call_operand.vmem [shape: f32[2,8,8,8,4], index: 0, kind: input, shape index: {}]   ;;  %s676_s1 = inlined_call_operand.vmem [shape: f32[2,3,3,3,4], index: 1, kind: output, shape index: {}]  }
   0x1   :  { %s560_s8 = smov 0   ;;  %s562_s9 = smov 0  }
   0x2   :  { %s564_s10 = smov 0   ;;  %s566_s11 = smov 0  }
   0x3   :  { %s568_s12 = smov 0  }
   0x4 LB: > { %s23_s13 = sadd.s32 1, %s532_s9  ;;  %s26_s14 = sadd.s32 1, %s536_s10  ;;  %s544_s12 = sphi %s568_s12, %s11_s12   ;;  %s540_s11 = sphi %s566_s11, %s682_s11   ;;  %s536_s10 = sphi %s564_s10, %s681_s10   ;;  %s532_s9 = sphi %s562_s9, %s680_s9   ;;  %s528_s8 = sphi %s560_s8, %s679_s8   ;;  %s524_s7 = sphi %s558_s7, %s678_s7   ;;  %s520_s6 = sphi %s556_s6, %s677_s6  }
   0x5   : > { %p24_p0 = scmp.ge.s32.totalorder %s23_s13, 3  ;;  %p396_p1 = scmp.ge.s32.totalorder %s544_s12, 1 }
   0x6   : > { %p122_p2 = scmp.lt.s32.totalorder %s544_s12, 19  ;;  %s30_s15 = sadd.s32 1, %s540_s11 }
   0x7   : > { %s684_s13 = smov (%p24_p0, %s23_s13), 0  ;;  %s686_s14 = smov (!%p24_p0, %s26_s14), %s536_s10 }
   0x8   : > { %p123_p3 = pnand %p396_p1, %p122_p2  ;;  %p28_p4 = scmp.ge.s32.totalorder %s686_s14, 3 }
   0x9   : > { %s397_s16 = sshll.u32 (!%p123_p3), %s524_s7, 1  ;;  %p154_p6 = scmp.lt.s32.totalorder (!%p123_p3), %s528_s8, 1 }
   0xa   : > { %s688_s14 = smov (%p28_p4, %s686_s14), 0  ;;  %s690_s15 = smov (!%p28_p4, %s30_s15), %s540_s11 }
   0xb   : > { %p32_p5 = scmp.ge.s32.totalorder %s690_s15, 2  ;;  %126 = sbr.rel (%p123_p3) target bundleno = 55 (0x37), region = 24 }
   0xc   : > { %s153_s17 = sadd.s32 (!%p123_p3), %s520_s6, %s397_s16  ;;  %p167_p7 = scmp.lt.s32.totalorder (!%p123_p3), %s524_s7, 2 }
   0xd   : > { %s692_s15 = smov (%p32_p5, %s690_s15), 0  ;;  %p156_p8 = scmp.lt.s32.totalorder (!%p123_p3), %s153_s17, 7 }
   0xe   : > { %p428_p9 = scmp.ne.s32.totalorder (!%p123_p3), %s520_s6, 0 }
  0x12   : > { %s694_s8 = smov (!%p154_p6, %s528_s8), 1  ;;  %s696_s17 = smov (!%p156_p8, %s153_s17), 7 }
  0x13   : > { %s399_s18 = sshll.u32 %s694_s8, 6  ;;  %s433_s19 = smul.u32 9, %s694_s8  ;;  %vm255_vm0 = vcmask (!%p428_p9), 26624  }
  0x14   : > { %s698_s7 = smov (!%p167_p7, %s524_s7), 2  ;;  %s398_s20 = sshll.u32 %s696_s17, 3 }
  0x15   : > { %s160_s21 = sadd.s32 %s399_s18, %s398_s20  ;;  %s432_s22 = smul.u32 3, %s698_s7 }
  0x16   : > { %s400_s23 = sshll.u32 %s160_s21, 3 }
  0x17   : > { %s609_s26 = scalar_lea.vmem %s675_s0, %s400_s23  ;;  %s171_s27 = sadd.s32 %s433_s19, %s432_s22 }
  0x18   : > { %s401_s28 = sshll.u32 %s171_s27, 2  ;;  %v174_v0 = vld [vmem:[%s609_s26] ss:$2 sm:$0x7] }
  0x19   : > { %s615_s2 = scalar_lea.vmem %s676_s1, %s401_s28  ;;  %v402_v1 = vld [vmem:[%s609_s26 + $0x10] ss:$2 sm:$0x7]  ;;  %v403_v2 = vld [vmem:[%s609_s26 + $0x20] ss:$2 sm:$0x7] }
  0x1a   : > { %v404_v3 = vld [vmem:[%s609_s26 + $0x1] ss:$2 sm:$0x7]  ;;  %v405_v4 = vld [vmem:[%s609_s26 + $0x11] ss:$2 sm:$0x7] }
  0x1b   : > { %v406_v5 = vld [vmem:[%s609_s26 + $0x21] ss:$2 sm:$0x7]  ;;  %v185_v6 = vmax.f32 %v174_v0, %v404_v3  ;;  %v186_v7 = vmax.f32 %v402_v1, %v405_v4  ;;  %v407_v8 = vld [vmem:[%s609_s26 + $0x2] ss:$2 sm:$0x7] }
  0x1c   : > { %v187_v9 = vmax.f32 %v403_v2, %v406_v5  ;;  %v408_v10 = vld [vmem:[%s609_s26 + $0x12] ss:$2 sm:$0x7]  ;;  %v409_v11 = vld [vmem:[%s609_s26 + $0x22] ss:$2 sm:$0x7] }
  0x1d   : > { %v194_v12 = vmax.f32 %v185_v6, %v407_v8  ;;  %v195_v13 = vmax.f32 %v186_v7, %v408_v10  ;;  %v410_v14 = vld [vmem:[%s609_s26 + $0x8] ss:$2 sm:$0x7]  ;;  %v411_v15 = vld [vmem:[%s609_s26 + $0x18] ss:$2 sm:$0x7] }
  0x1e   : > { %v196_v16 = vmax.f32 %v187_v9, %v409_v11  ;;  %v412_v17 = vld [vmem:[%s609_s26 + $0x28] ss:$2 sm:$0x7]  ;;  %v413_v18 = vld [vmem:[%s609_s26 + $0x9] ss:$2 sm:$0x7] }
  0x1f   : > { %v203_v19 = vmax.f32 %v194_v12, %v410_v14  ;;  %v204_v20 = vmax.f32 %v195_v13, %v411_v15  ;;  %v414_v21 = vld [vmem:[%s609_s26 + $0x19] ss:$2 sm:$0x7]  ;;  %v415_v22 = vld [vmem:[%s609_s26 + $0x29] ss:$2 sm:$0x7] }
  0x20   : > { %v205_v23 = vmax.f32 %v196_v16, %v412_v17  ;;  %v416_v24 = vld [vmem:[%s609_s26 + $0xa] ss:$2 sm:$0x7]  ;;  %v417_v25 = vld [vmem:[%s609_s26 + $0x1a] ss:$2 sm:$0x7] }
  0x21   : > { %v212_v26 = vmax.f32 %v203_v19, %v413_v18  ;;  %v213_v27 = vmax.f32 %v204_v20, %v414_v21  ;;  %v418_v28 = vld [vmem:[%s609_s26 + $0x2a] ss:$2 sm:$0x7]  ;;  %v419_v30 = vld [vmem:[%s609_s26 + $0x10] ss:$2 sm:$0x7] }
  0x22   : > { %v214_v29 = vmax.f32 %v205_v23, %v415_v22  ;;  %v420_v31 = vld [vmem:[%s609_s26 + $0x20] ss:$2 sm:$0x7]  ;;  %v421_v34 = vld [vmem:[%s609_s26 + $0x30] ss:$2 sm:$0x7] }
  0x23   : > { %v221_v32 = vmax.f32 %v212_v26, %v416_v24  ;;  %v222_v33 = vmax.f32 %v213_v27, %v417_v25  ;;  %v422_v36 = vld [vmem:[%s609_s26 + $0x11] ss:$2 sm:$0x7]  ;;  %v423_v37 = vld [vmem:[%s609_s26 + $0x21] ss:$2 sm:$0x7] }
  0x24   : > { %v223_v35 = vmax.f32 %v214_v29, %v418_v28  ;;  %v424_v40 = vld [vmem:[%s609_s26 + $0x31] ss:$2 sm:$0x7]  ;;  %v425_v42 = vld [vmem:[%s609_s26 + $0x12] ss:$2 sm:$0x7] }
  0x25   : > { %v230_v38 = vmax.f32 %v221_v32, %v419_v30  ;;  %v231_v39 = vmax.f32 %v222_v33, %v420_v31  ;;  %v426_v43 = vld [vmem:[%s609_s26 + $0x22] ss:$2 sm:$0x7]  ;;  %v427_v46 = vld [vmem:[%s609_s26 + $0x32] ss:$2 sm:$0x7] }
  0x26   : > { %v232_v41 = vmax.f32 %v223_v35, %v421_v34  ;;  %254 = sbr.rel (%p428_p9) target bundleno = 45 (0x2d), region = 28 }
  0x27   : > { %v239_v44 = vmax.f32 %v230_v38, %v422_v36  ;;  %v240_v45 = vmax.f32 %v231_v39, %v423_v37 }
  0x28   : > { %v241_v47 = vmax.f32 %v232_v41, %v424_v40 }
  0x29   : > { %v248_v48 = vmax.f32 %v239_v44, %v425_v42  ;;  %v249_v49 = vmax.f32 %v240_v45, %v426_v43 }
  0x2a   : > { %v250_v50 = vmax.f32 %v241_v47, %v427_v46 }
  0x2b   : > { %256 = vst.msk [vmem:[%s615_s2] sm:$0x7] (!%p428_p9), %vm255_vm0, %v248_v48  ;;  %257 = vst.msk [vmem:[%s615_s2 + $0x4] sm:$0x7] (!%p428_p9), %vm255_vm0, %v249_v49 }
  0x2c   : > { %258 = vst.msk [vmem:[%s615_s2 + $0x8] sm:$0x7] (!%p428_p9), %vm255_vm0, %v250_v50 }
  0x2d PF: > { %p429_p10 = scmp.le.s32.totalorder %s520_s6, 0 }
  0x2e   : > { %vm269_vm1 = vcmask (!%p429_p10), 26624  }
  0x2f   : > { %262 = sbr.rel (%p429_p10) target bundleno = 55 (0x37), region = 32 }
  0x32   : > { %v263_v51 = vld [vmem:[%s615_s2] sm:$0x7] (!%p429_p10)  ;;  %v264_v52 = vld [vmem:[%s615_s2 + $0x4] sm:$0x7] (!%p429_p10) }
  0x33   : > { %v266_v53 = vmax.f32 (!%p429_p10), %v263_v51, %v248_v48  ;;  %v267_v54 = vmax.f32 (!%p429_p10), %v264_v52, %v249_v49  ;;  %v265_v55 = vld [vmem:[%s615_s2 + $0x8] sm:$0x7] (!%p429_p10) }
  0x34   : > { %v268_v56 = vmax.f32 (!%p429_p10), %v265_v55, %v250_v50 }
  0x35   : > { %270 = vst.msk [vmem:[%s615_s2] sm:$0x7] (!%p429_p10), %vm269_vm1, %v266_v53  ;;  %271 = vst.msk [vmem:[%s615_s2 + $0x4] sm:$0x7] (!%p429_p10), %vm269_vm1, %v267_v54 }
  0x36   : > { %272 = vst.msk [vmem:[%s615_s2 + $0x8] sm:$0x7] %vm269_vm1, %v268_v56 }
  0x37 PF: > { %s11_s12 = sadd.s32 1, %s544_s12   ;;  %s677_s6 = smov %s532_s9 }
  0x38   : > { %p8_p11 = scmp.ge.s32.totalorder %s11_s12, 20   ;;  %s678_s7 = smov %s536_s10 }
  0x39   : > { %s679_s8 = smov %s540_s11  ;;  %s680_s9 = smov %s684_s13 }
  0x3a   : > { %s681_s10 = smov %s688_s14  ;;  %s682_s11 = smov %s692_s15 }
  0x3b   :  { %10 = sbr.rel (!%p8_p11) target bundleno = 4 (0x4), region = 88 }

</bundles_post_ra>
